<compile_context>
chip_gen: v5e
topology: v5e:2x2
jax: 0.10.0
libtpu: 0.0.40
codegen_flags: <defaults>
</compile_context>

<pallas_src>
import functools

import jax
import jax.numpy as jnp
from jax.experimental import pallas as pl
from jax.experimental.pallas import tpu as pltpu


_TM = 1024                                  # preferred activation row block
_TN = 1024                                  # preferred output column tile
_VMEM_LIMIT_BYTES = 48 * 1024 * 1024        # > v5e 16 MiB default, < v7x 64 MiB


def _round_up(x, m):
    return (x + m - 1) // m * m


def _plan_rows(M, pref=_TM):
    """Row tile + padded rows.  Prefer >=2 row blocks so the value kernel's
    only 'parallel' axis can be sharded across both v7x TensorCores."""
    tm = pref if M >= pref else _round_up(M, 8)
    if M > 8 and _round_up(M, tm) // tm < 2:
        tm = _round_up((M + 1) // 2, 8)
    return tm, _round_up(M, tm)


def _plan_cols(D, pref=_TN):
    """Column tile + padded width (always a multiple of the 128-lane vreg).
    Prefers a tile that divides D exactly to avoid padded compute / slices."""
    if D < pref:
        Dp = _round_up(D, 128)
        return Dp, Dp
    for t in (pref, pref // 2, pref // 4):
        if D % t == 0:
            return t, D
    return pref, _round_up(D, pref)


# ---------------------------------------------------------------------------
# Plain dense kernel: y = act(x @ w + b)
#   x: (tm, K) resident bf16 slab (block index depends only on i)
#   w: (K, tn) bf16 column panel, b: (1, tn) f32
# ---------------------------------------------------------------------------
def _dense_kernel(x_ref, w_ref, b_ref, o_ref, *, activation):
    y = jnp.dot(x_ref[...], w_ref[...], preferred_element_type=jnp.float32)
    y = y + b_ref[...]                      # bias already f32
    if activation == "tanh":
        y = jnp.tanh(y)
    o_ref[...] = y.astype(o_ref.dtype)


def dense(x, w, b, *, activation=None, out_dtype=jnp.float32, tm, tn):
    """y = act(x @ w + b); inputs pre-cast/pre-padded (see prepare_params)."""
    M, K = x.shape
    K2, N = w.shape
    assert K == K2 and b.shape == (1, N)
    assert M % tm == 0 and N % tn == 0
    grid = (M // tm, N // tn)
    return pl.pallas_call(
        functools.partial(_dense_kernel, activation=activation),
        out_shape=jax.ShapeDtypeStruct((M, N), out_dtype),
        grid_spec=pltpu.PrefetchScalarGridSpec(
            num_scalar_prefetch=0,
            grid=grid,
            in_specs=[
                # Resident (tm, K) activation slab: block index only depends on
                # i, so it is NOT re-DMA'd while j sweeps the N/vocab tiles.
                pl.BlockSpec((tm, K), lambda i, j: (i, 0)),
                pl.BlockSpec((K, tn), lambda i, j: (0, j)),
                pl.BlockSpec((1, tn), lambda i, j: (0, j)),
            ],
            out_specs=pl.BlockSpec((tm, tn), lambda i, j: (i, j)),
        ),
        compiler_params=pltpu.CompilerParams(
            dimension_semantics=("parallel", "parallel"),
            vmem_limit_bytes=_VMEM_LIMIT_BYTES),
        cost_estimate=pl.CostEstimate(
            flops=2 * M * N * K,
            transcendentals=M * N if activation == "tanh" else 0,
            bytes_accessed=x.size * x.dtype.itemsize
            + (M // tm) * w.size * w.dtype.itemsize + b.size * 4
            + M * N * jnp.dtype(out_dtype).itemsize),
    )(x, w, b)


# ---------------------------------------------------------------------------
# Fused value path: value = tanh(x @ w + b) @ sh_w + sh_b
# The (tm, tn) hidden tile stays in VMEM; the scalar head is a VPU multiply +
# row reduction accumulated across the hidden (j) axis.  Hidden never hits HBM
# and no lane-width-1 matmul is issued.
# ---------------------------------------------------------------------------
def _backbone_value_kernel(x_ref, w_ref, b_ref, shw_ref, shb_ref, v_ref,
                           vacc_ref):
    j = pl.program_id(1)

    @pl.when(j == 0)
    def _():
        vacc_ref[...] = jnp.zeros_like(vacc_ref)

    y = jnp.tanh(jnp.dot(x_ref[...], w_ref[...],
                         preferred_element_type=jnp.float32) + b_ref[...])
    vacc_ref[...] += jnp.sum(y * shw_ref[...], axis=-1, keepdims=True)

    @pl.when(j == pl.num_programs(1) - 1)
    def _():
        v_ref[...] = (vacc_ref[...] + shb_ref[...]).astype(v_ref.dtype)


def backbone_scalar_head(x, w, b, sh_w_row, sh_b, *, tm, tn):
    """(M, 1) value logits from the value backbone + scalar head, fused."""
    M, K = x.shape
    K2, N = w.shape
    assert K == K2 and b.shape == (1, N) and sh_w_row.shape == (1, N)
    assert M % tm == 0 and N % tn == 0
    grid = (M // tm, N // tn)
    return pl.pallas_call(
        _backbone_value_kernel,
        out_shape=jax.ShapeDtypeStruct((M, 1), jnp.float32),
        grid_spec=pltpu.PrefetchScalarGridSpec(
            num_scalar_prefetch=0,
            grid=grid,
            in_specs=[
                pl.BlockSpec((tm, K), lambda i, j: (i, 0)),   # resident slab
                pl.BlockSpec((K, tn), lambda i, j: (0, j)),
                pl.BlockSpec((1, tn), lambda i, j: (0, j)),
                pl.BlockSpec((1, tn), lambda i, j: (0, j)),
                pl.BlockSpec((1, 1), lambda i, j: (0, 0)),
            ],
            out_specs=pl.BlockSpec((tm, 1), lambda i, j: (i, 0)),
            scratch_shapes=[pltpu.VMEM((tm, 1), jnp.float32)],
        ),
        compiler_params=pltpu.CompilerParams(
            # value accumulates across the hidden (j) axis -> arbitrary;
            # rows (i, >=2 blocks when possible) stay parallel for megacore.
            dimension_semantics=("parallel", "arbitrary"),
            vmem_limit_bytes=_VMEM_LIMIT_BYTES),
        cost_estimate=pl.CostEstimate(
            flops=2 * M * N * K + 3 * M * N,
            transcendentals=M * N,
            bytes_accessed=x.size * 2 + (M // tm) * w.size * 2
            + (b.size + sh_w_row.size + 1) * 4 + M * 4),
    )(x, w, b, sh_w_row, sh_b)


# ---------------------------------------------------------------------------
# Synthetic "PyTorch-like" parameter construction (deterministic, f32)
# ---------------------------------------------------------------------------
def make_params(key, vocab, hidden):
    ks = jax.random.split(key, 8)
    scale = 0.02
    return {
        # value_model.lm_backbone
        "vb_embed": scale * jax.random.normal(ks[0], (vocab, hidden), jnp.float32),
        "vb_w": scale * jax.random.normal(ks[1], (hidden, hidden), jnp.float32),
        "vb_b": jnp.zeros((hidden,), jnp.float32),
        # value_model.scalar_head : Linear(hidden, 1)
        "sh_w": scale * jax.random.normal(ks[2], (hidden, 1), jnp.float32),
        "sh_b": jnp.zeros((1,), jnp.float32),
        # policy backbone (its own weights)
        "pb_embed": scale * jax.random.normal(ks[3], (vocab, hidden), jnp.float32),
        "pb_w": scale * jax.random.normal(ks[4], (hidden, hidden), jnp.float32),
        "pb_b": jnp.zeros((hidden,), jnp.float32),
        # policy lm_head : Linear(hidden, vocab)
        "lm_w": scale * jax.random.normal(ks[5], (hidden, vocab), jnp.float32),
        "lm_b": jnp.zeros((vocab,), jnp.float32),
    }


def prepare_params(params):
    """One-time (init-time) pad + f32->bf16 cast of every weight / embedding.
    Hoisted out of the forward path so no per-call weight casts/pads remain."""
    V, H = params["vb_embed"].shape
    tn_h, Hp = _plan_cols(H)
    tn_v, Vp = _plan_cols(V)
    bf, f32 = jnp.bfloat16, jnp.float32

    def pad2(x, rows, cols, dtype):
        x = x.astype(dtype)
        r, c = x.shape
        if (r, c) != (rows, cols):
            x = jnp.pad(x, ((0, rows - r), (0, cols - c)))
        return x

    prepped = {
        "vb_embed": pad2(params["vb_embed"], V, Hp, bf),
        "vb_w":     pad2(params["vb_w"], Hp, Hp, bf),
        "vb_b":     pad2(params["vb_b"].reshape(1, H), 1, Hp, f32),
        "sh_w":     pad2(params["sh_w"].reshape(1, H), 1, Hp, f32),  # (H,1)->(1,Hp)
        "sh_b":     params["sh_b"].reshape(1, 1).astype(f32),
        "pb_embed": pad2(params["pb_embed"], V, Hp, bf),
        "pb_w":     pad2(params["pb_w"], Hp, Hp, bf),
        "pb_b":     pad2(params["pb_b"].reshape(1, H), 1, Hp, f32),
        "lm_w":     pad2(params["lm_w"], Hp, Vp, bf),
        "lm_b":     pad2(params["lm_b"].reshape(1, V), 1, Vp, f32),
    }
    plan = {"H": H, "V": V, "Hp": Hp, "Vp": Vp, "tn_h": tn_h, "tn_v": tn_v}
    return prepped, plan


# ---------------------------------------------------------------------------
# PolicyAndValueWrapper.forward
# ---------------------------------------------------------------------------
def policy_and_value_forward(prepped, plan, input_ids):
    """input_ids: (B, S) int32 -> (policy_logits (B,S,V), value_logits (B,S,1))."""
    B, S = input_ids.shape
    M = B * S
    H, V, Vp = plan["H"], plan["V"], plan["Vp"]
    tn_h, tn_v = plan["tn_h"], plan["tn_v"]
    tm, Mp = _plan_rows(M)

    ids = input_ids.reshape(-1)
    if Mp != M:
        ids = jnp.pad(ids, (0, Mp - M))     # pad the cheap int ids, not the slab

    # ---- value_model.lm_backbone + scalar_head, one fused Pallas call ------
    # TODO(synk): fuse the embedding gather into the kernel (scalar-prefetched
    # ids in SMEM + per-row DMA gather) instead of the jnp.take glue.
    vb_emb = jnp.take(prepped["vb_embed"], ids, axis=0)            # (Mp, Hp) bf16
    value = backbone_scalar_head(vb_emb, prepped["vb_w"], prepped["vb_b"],
                                 prepped["sh_w"], prepped["sh_b"],
                                 tm=tm, tn=tn_h)
    value_logits = value[:M].reshape(B, S, 1)

    # ---- self.policy(**kwargs): its own backbone + LM head -----------------
    # TODO(synk): fuse these two denses (resident tanh-hidden scratch) so the
    # (Mp, Hp) bf16 hidden never round-trips HBM.
    pb_emb = jnp.take(prepped["pb_embed"], ids, axis=0)            # (Mp, Hp) bf16
    p_hidden = dense(pb_emb, prepped["pb_w"], prepped["pb_b"],
                     activation="tanh", out_dtype=jnp.bfloat16,
                     tm=tm, tn=tn_h)                               # (Mp, Hp) bf16
    logits = dense(p_hidden, prepped["lm_w"], prepped["lm_b"],
                   out_dtype=jnp.float32, tm=tm, tn=tn_v)          # (Mp, Vp) f32
    # TODO(synk): at real vocab sizes keep logits padded to Vp (mask downstream)
    # and/or emit bf16 logits to avoid this slice copy of the largest tensor.
    policy_logits = logits[:M, :V].reshape(B, S, V)

    # Matches `return (self.policy(**kwargs), logits)`
    return policy_logits, value_logits


# ---------------------------------------------------------------------------
# Pure-JAX reference mirroring the kernel numerics (bf16 operands, f32 acc)
# ---------------------------------------------------------------------------
def reference_forward(params, input_ids):
    B, S = input_ids.shape
    V, H = params["vb_embed"].shape
    ids = input_ids.reshape(-1)
    bf, f32 = jnp.bfloat16, jnp.float32

    def mm(a, w):
        return jnp.dot(a.astype(bf), w.astype(bf), preferred_element_type=f32)

    vb_emb = jnp.take(params["vb_embed"], ids, axis=0)
    hid = jnp.tanh(mm(vb_emb, params["vb_w"]) + params["vb_b"])
    val = (hid @ params["sh_w"] + params["sh_b"]).reshape(B, S, 1)

    pb_emb = jnp.take(params["pb_embed"], ids, axis=0)
    ph = jnp.tanh(mm(pb_emb, params["pb_w"]) + params["pb_b"]).astype(bf)
    pol = (mm(ph, params["lm_w"]) + params["lm_b"]).reshape(B, S, V)
    return pol, val


if __name__ == "__main__":
    B, S, H, V = 2, 8, 32, 64

    key = jax.random.PRNGKey(0)
    k_param, k_ids = jax.random.split(key)
    params = make_params(k_param, V, H)
    input_ids = jax.random.randint(k_ids, (B, S), 0, V, dtype=jnp.int32)

    # One-time weight preparation (pad + bf16 cast) — hoisted out of forward.
    prepped, plan = prepare_params(params)
    jax.block_until_ready(prepped)

    fwd = jax.jit(lambda p, ids: policy_and_value_forward(p, plan, ids))
    policy_logits, value_logits = fwd(prepped, input_ids)
    jax.block_until_ready((policy_logits, value_logits))

    ref_pol, ref_val = reference_forward(params, input_ids)
    assert policy_logits.shape == (B, S, V)
    assert value_logits.shape == (B, S, 1)
    assert jnp.allclose(policy_logits, ref_pol, atol=1e-4, rtol=1e-3), (
        float(jnp.max(jnp.abs(policy_logits - ref_pol))))
    assert jnp.allclose(value_logits, ref_val, atol=1e-4, rtol=1e-3), (
        float(jnp.max(jnp.abs(value_logits - ref_val))))

    print("KERNEL_OK")
</pallas_src>

<mosaic_0001>
module attributes {stable_mosaic.version = 11 : i64} {
  func.func @_backbone_value_kernel(%arg0: i32, %arg1: i32, %arg2: memref<8x128xbf16, #tpu.memory_space<vmem>>, %arg3: memref<128x128xbf16, #tpu.memory_space<vmem>>, %arg4: memref<1x128xf32, #tpu.memory_space<vmem>>, %arg5: memref<1x128xf32, #tpu.memory_space<vmem>>, %arg6: memref<1x1xf32, #tpu.memory_space<vmem>>, %arg7: memref<8x1xf32, #tpu.memory_space<vmem>>, %arg8: memref<8x1xf32, #tpu.memory_space<vmem>>) attributes {dimension_semantics = [#tpu.dimension_semantics<parallel>, #tpu.dimension_semantics<arbitrary>], iteration_bounds = array<i64: 2, 1>, scalar_prefetch = 0 : i64, scratch_operands = 1 : i64, tpu.core_type = #tpu.core_type<tc>, window_params = [{transform_indices = @transform_0, window_bounds = array<i64: 8, 128>}, {transform_indices = @transform_1, window_bounds = array<i64: 128, 128>}, {transform_indices = @transform_2, window_bounds = array<i64: 1, 128>}, {transform_indices = @transform_3, window_bounds = array<i64: 1, 128>}, {pipeline_mode = #tpu.pipeline_mode<synchronous>, transform_indices = @transform_4, window_bounds = array<i64: 1, 1>}, {transform_indices = @transform_5, window_bounds = array<i64: 8, 1>}]} {
    %c0_i32 = arith.constant 0 : i32
    %0 = arith.cmpi eq, %arg1, %c0_i32 : i32
    %1 = arith.extui %0 : i1 to i32
    %c0_i32_0 = arith.constant 0 : i32
    %2 = arith.cmpi ne, %1, %c0_i32_0 : i32
    scf.if %2 {
      %cst_15 = arith.constant 0.000000e+00 : f32
      %21 = vector.broadcast %cst_15 : f32 to vector<8x1xf32>
      %c0_16 = arith.constant 0 : index
      %c0_17 = arith.constant 0 : index
      %22 = vector.load %arg8[%c0_16, %c0_17] : memref<8x1xf32, #tpu.memory_space<vmem>>, vector<8x1xf32>
      tpu.vector_store %arg8[%c0_16, %c0_17], %21 {strides = array<i32>} : memref<8x1xf32, #tpu.memory_space<vmem>>, vector<8x1xf32>,
    } else {
    }
    %c0 = arith.constant 0 : index
    %c0_1 = arith.constant 0 : index
    %3 = vector.load %arg2[%c0, %c0_1] : memref<8x128xbf16, #tpu.memory_space<vmem>>, vector<8x128xbf16>
    %c0_2 = arith.constant 0 : index
    %c0_3 = arith.constant 0 : index
    %4 = vector.load %arg3[%c0_2, %c0_3] : memref<128x128xbf16, #tpu.memory_space<vmem>>, vector<128x128xbf16>
    %cst = arith.constant dense<0.000000e+00> : vector<8x128xf32>
    %5 = tpu.matmul %3, %4, %cst {dimension_numbers = #tpu.dot_dimension_numbers<[1], [0], [0], [1], [0, 0, 1, 1], [], []>} : vector<8x128xbf16>, vector<128x128xbf16>, vector<8x128xf32> -> vector<8x128xf32>
    %c0_4 = arith.constant 0 : index
    %c0_5 = arith.constant 0 : index
    %6 = vector.load %arg4[%c0_4, %c0_5] : memref<1x128xf32, #tpu.memory_space<vmem>>, vector<1x128xf32>
    %7 = vector.broadcast %6 : vector<1x128xf32> to vector<8x128xf32>
    %8 = arith.addf %5, %7 : vector<8x128xf32>
    %9 = math.tanh %8 : vector<8x128xf32>
    %c0_6 = arith.constant 0 : index
    %c0_7 = arith.constant 0 : index
    %10 = vector.load %arg8[%c0_6, %c0_7] : memref<8x1xf32, #tpu.memory_space<vmem>>, vector<8x1xf32>
    %c0_8 = arith.constant 0 : index
    %c0_9 = arith.constant 0 : index
    %11 = vector.load %arg5[%c0_8, %c0_9] : memref<1x128xf32, #tpu.memory_space<vmem>>, vector<1x128xf32>
    %12 = vector.broadcast %11 : vector<1x128xf32> to vector<8x128xf32>
    %13 = arith.mulf %9, %12 : vector<8x128xf32>
    %cst_10 = arith.constant dense<0.000000e+00> : vector<8xf32>
    %14 = vector.multi_reduction <add>, %13, %cst_10 [1] : vector<8x128xf32> to vector<8xf32>
    %15 = vector.shape_cast %14 : vector<8xf32> to vector<8x1xf32>
    %16 = arith.addf %10, %15 : vector<8x1xf32>
    %c0_11 = arith.constant 0 : index
    %c0_12 = arith.constant 0 : index
    %17 = vector.load %arg8[%c0_11, %c0_12] : memref<8x1xf32, #tpu.memory_space<vmem>>, vector<8x1xf32>
    tpu.vector_store %arg8[%c0_11, %c0_12], %16 {strides = array<i32>} : memref<8x1xf32, #tpu.memory_space<vmem>>, vector<8x1xf32>,
    %c0_i32_13 = arith.constant 0 : i32
    %18 = arith.cmpi eq, %arg1, %c0_i32_13 : i32
    %19 = arith.extui %18 : i1 to i32
    %c0_i32_14 = arith.constant 0 : i32
    %20 = arith.cmpi ne, %19, %c0_i32_14 : i32
    scf.if %20 {
      %c0_15 = arith.constant 0 : index
      %c0_16 = arith.constant 0 : index
      %21 = vector.load %arg8[%c0_15, %c0_16] : memref<8x1xf32, #tpu.memory_space<vmem>>, vector<8x1xf32>
      %c0_17 = arith.constant 0 : index
      %c0_18 = arith.constant 0 : index
      %22 = vector.load %arg6[%c0_17, %c0_18] : memref<1x1xf32, #tpu.memory_space<vmem>>, vector<1x1xf32>
      %23 = vector.broadcast %22 : vector<1x1xf32> to vector<8x1xf32>
      %24 = arith.addf %21, %23 : vector<8x1xf32>
      %c0_19 = arith.constant 0 : index
      %c0_20 = arith.constant 0 : index
      %25 = vector.load %arg7[%c0_19, %c0_20] : memref<8x1xf32, #tpu.memory_space<vmem>>, vector<8x1xf32>
      tpu.vector_store %arg7[%c0_19, %c0_20], %24 {strides = array<i32>} : memref<8x1xf32, #tpu.memory_space<vmem>>, vector<8x1xf32>,
    } else {
    }
    return
  }
  func.func @transform_0(%arg0: i32, %arg1: i32) -> (i32, i32) {
    %c0_i32 = arith.constant 0 : i32
    %c0_i32_0 = arith.constant 0 : i32
    return %arg0, %c0_i32 : i32, i32
  }
  func.func @transform_1(%arg0: i32, %arg1: i32) -> (i32, i32) {
    %c0_i32 = arith.constant 0 : i32
    %c0_i32_0 = arith.constant 0 : i32
    return %c0_i32, %arg1 : i32, i32
  }
  func.func @transform_2(%arg0: i32, %arg1: i32) -> (i32, i32) {
    %c0_i32 = arith.constant 0 : i32
    %c0_i32_0 = arith.constant 0 : i32
    return %c0_i32, %arg1 : i32, i32
  }
  func.func @transform_3(%arg0: i32, %arg1: i32) -> (i32, i32) {
    %c0_i32 = arith.constant 0 : i32
    %c0_i32_0 = arith.constant 0 : i32
    return %c0_i32, %arg1 : i32, i32
  }
  func.func @transform_4(%arg0: i32, %arg1: i32) -> (i32, i32) {
    %c0_i32 = arith.constant 0 : i32
    %c0_i32_0 = arith.constant 0 : i32
    %c0_i32_1 = arith.constant 0 : i32
    return %c0_i32, %c0_i32_0 : i32, i32
  }
  func.func @transform_5(%arg0: i32, %arg1: i32) -> (i32, i32) {
    %c0_i32 = arith.constant 0 : i32
    %c0_i32_0 = arith.constant 0 : i32
    return %arg0, %c0_i32 : i32, i32
  }
}

module attributes {stable_mosaic.version = 11 : i64} {
  func.func @_dense_kernel(%arg0: i32, %arg1: i32, %arg2: memref<8x128xbf16, #tpu.memory_space<vmem>>, %arg3: memref<128x128xbf16, #tpu.memory_space<vmem>>, %arg4: memref<1x128xf32, #tpu.memory_space<vmem>>, %arg5: memref<8x128xbf16, #tpu.memory_space<vmem>>) attributes {dimension_semantics = [#tpu.dimension_semantics<parallel>, #tpu.dimension_semantics<parallel>], iteration_bounds = array<i64: 2, 1>, scalar_prefetch = 0 : i64, scratch_operands = 0 : i64, tpu.core_type = #tpu.core_type<tc>, window_params = [{transform_indices = @transform_0, window_bounds = array<i64: 8, 128>}, {transform_indices = @transform_1, window_bounds = array<i64: 128, 128>}, {transform_indices = @transform_2, window_bounds = array<i64: 1, 128>}, {transform_indices = @transform_3, window_bounds = array<i64: 8, 128>}]} {
    %c0 = arith.constant 0 : index
    %c0_0 = arith.constant 0 : index
    %0 = vector.load %arg2[%c0, %c0_0] : memref<8x128xbf16, #tpu.memory_space<vmem>>, vector<8x128xbf16>
    %c0_1 = arith.constant 0 : index
    %c0_2 = arith.constant 0 : index
    %1 = vector.load %arg3[%c0_1, %c0_2] : memref<128x128xbf16, #tpu.memory_space<vmem>>, vector<128x128xbf16>
    %cst = arith.constant dense<0.000000e+00> : vector<8x128xf32>
    %2 = tpu.matmul %0, %1, %cst {dimension_numbers = #tpu.dot_dimension_numbers<[1], [0], [0], [1], [0, 0, 1, 1], [], []>} : vector<8x128xbf16>, vector<128x128xbf16>, vector<8x128xf32> -> vector<8x128xf32>
    %c0_3 = arith.constant 0 : index
    %c0_4 = arith.constant 0 : index
    %3 = vector.load %arg4[%c0_3, %c0_4] : memref<1x128xf32, #tpu.memory_space<vmem>>, vector<1x128xf32>
    %4 = vector.broadcast %3 : vector<1x128xf32> to vector<8x128xf32>
    %5 = arith.addf %2, %4 : vector<8x128xf32>
    %6 = math.tanh %5 : vector<8x128xf32>
    %7 = arith.truncf %6 : vector<8x128xf32> to vector<8x128xbf16>
    %c0_5 = arith.constant 0 : index
    %c0_6 = arith.constant 0 : index
    %8 = vector.load %arg5[%c0_5, %c0_6] : memref<8x128xbf16, #tpu.memory_space<vmem>>, vector<8x128xbf16>
    tpu.vector_store %arg5[%c0_5, %c0_6], %7 {strides = array<i32>} : memref<8x128xbf16, #tpu.memory_space<vmem>>, vector<8x128xbf16>,
    return
  }
  func.func @transform_0(%arg0: i32, %arg1: i32) -> (i32, i32) {
    %c0_i32 = arith.constant 0 : i32
    %c0_i32_0 = arith.constant 0 : i32
    return %arg0, %c0_i32 : i32, i32
  }
  func.func @transform_1(%arg0: i32, %arg1: i32) -> (i32, i32) {
    %c0_i32 = arith.constant 0 : i32
    %c0_i32_0 = arith.constant 0 : i32
    return %c0_i32, %arg1 : i32, i32
  }
  func.func @transform_2(%arg0: i32, %arg1: i32) -> (i32, i32) {
    %c0_i32 = arith.constant 0 : i32
    %c0_i32_0 = arith.constant 0 : i32
    return %c0_i32, %arg1 : i32, i32
  }
  func.func @transform_3(%arg0: i32, %arg1: i32) -> (i32, i32) {
    %c0_i32 = arith.constant 0 : i32
    return %arg0, %arg1 : i32, i32
  }
}

module attributes {stable_mosaic.version = 11 : i64} {
  func.func @_dense_kernel(%arg0: i32, %arg1: i32, %arg2: memref<8x128xbf16, #tpu.memory_space<vmem>>, %arg3: memref<128x128xbf16, #tpu.memory_space<vmem>>, %arg4: memref<1x128xf32, #tpu.memory_space<vmem>>, %arg5: memref<8x128xf32, #tpu.memory_space<vmem>>) attributes {dimension_semantics = [#tpu.dimension_semantics<parallel>, #tpu.dimension_semantics<parallel>], iteration_bounds = array<i64: 2, 1>, scalar_prefetch = 0 : i64, scratch_operands = 0 : i64, tpu.core_type = #tpu.core_type<tc>, window_params = [{transform_indices = @transform_0, window_bounds = array<i64: 8, 128>}, {transform_indices = @transform_1, window_bounds = array<i64: 128, 128>}, {transform_indices = @transform_2, window_bounds = array<i64: 1, 128>}, {transform_indices = @transform_3, window_bounds = array<i64: 8, 128>}]} {
    %c0 = arith.constant 0 : index
    %c0_0 = arith.constant 0 : index
    %0 = vector.load %arg2[%c0, %c0_0] : memref<8x128xbf16, #tpu.memory_space<vmem>>, vector<8x128xbf16>
    %c0_1 = arith.constant 0 : index
    %c0_2 = arith.constant 0 : index
    %1 = vector.load %arg3[%c0_1, %c0_2] : memref<128x128xbf16, #tpu.memory_space<vmem>>, vector<128x128xbf16>
    %cst = arith.constant dense<0.000000e+00> : vector<8x128xf32>
    %2 = tpu.matmul %0, %1, %cst {dimension_numbers = #tpu.dot_dimension_numbers<[1], [0], [0], [1], [0, 0, 1, 1], [], []>} : vector<8x128xbf16>, vector<128x128xbf16>, vector<8x128xf32> -> vector<8x128xf32>
    %c0_3 = arith.constant 0 : index
    %c0_4 = arith.constant 0 : index
    %3 = vector.load %arg4[%c0_3, %c0_4] : memref<1x128xf32, #tpu.memory_space<vmem>>, vector<1x128xf32>
    %4 = vector.broadcast %3 : vector<1x128xf32> to vector<8x128xf32>
    %5 = arith.addf %2, %4 : vector<8x128xf32>
    %c0_5 = arith.constant 0 : index
    %c0_6 = arith.constant 0 : index
    %6 = vector.load %arg5[%c0_5, %c0_6] : memref<8x128xf32, #tpu.memory_space<vmem>>, vector<8x128xf32>
    tpu.vector_store %arg5[%c0_5, %c0_6], %5 {strides = array<i32>} : memref<8x128xf32, #tpu.memory_space<vmem>>, vector<8x128xf32>,
    return
  }
  func.func @transform_0(%arg0: i32, %arg1: i32) -> (i32, i32) {
    %c0_i32 = arith.constant 0 : i32
    %c0_i32_0 = arith.constant 0 : i32
    return %arg0, %c0_i32 : i32, i32
  }
  func.func @transform_1(%arg0: i32, %arg1: i32) -> (i32, i32) {
    %c0_i32 = arith.constant 0 : i32
    %c0_i32_0 = arith.constant 0 : i32
    return %c0_i32, %arg1 : i32, i32
  }
  func.func @transform_2(%arg0: i32, %arg1: i32) -> (i32, i32) {
    %c0_i32 = arith.constant 0 : i32
    %c0_i32_0 = arith.constant 0 : i32
    return %c0_i32, %arg1 : i32, i32
  }
  func.func @transform_3(%arg0: i32, %arg1: i32) -> (i32, i32) {
    %c0_i32 = arith.constant 0 : i32
    return %arg0, %arg1 : i32, i32
  }
}

</mosaic_0001>

<bundles_post_ra>
// kernel: _lambda_.3
= control target key start
LH: loop header
LB: loop body
LE: loop exit
PB: predicated region body
PF: predicated region fallthrough
CT: control target
= control target key end

     0   :  { %s630_s20 = smov 0   ;;  %s632_s21 = smov 0   ;;  %s700_s0 = inlined_call_operand.vmem [shape: bf16[16,128], index: 0, kind: input, shape index: {}]   ;;  %s701_s1 = inlined_call_operand.vmem [shape: bf16[128,128], index: 1, kind: input, shape index: {}]   ;;  %s702_s2 = inlined_call_operand.vmem [shape: f32[1,128], index: 2, kind: input, shape index: {}]   ;;  %s703_s3 = inlined_call_operand.vmem [shape: f32[1,128], index: 3, kind: input, shape index: {}]   ;;  %s704_s4 = inlined_call_operand.<no memory space> [shape: f32[1,1], index: 4, kind: input, shape index: {}]   ;;  %s705_s5 = inlined_call_operand.vmem [shape: f32[16,1], index: 5, kind: output, shape index: {}]  }
   0x1   :  { %v10_v0 = vstv %s704_s4  ;;  %s634_s22 = smov 0  }
   0x2   :  { %11 = vst [vmem:[#allocation3] sm:$0x1] %v10_v0 }
   0x3 LB: > { %s29_s4 = sadd.s32 1, %s590_s21  ;;  %p497_p0 = scmp.ge.s32.totalorder %s594_s22, 1  ;;  %s594_s22 = sphi %s634_s22, %s17_s22   ;;  %s590_s21 = sphi %s632_s21, %s707_s21   ;;  %s586_s20 = sphi %s630_s20, %s706_s20  }
   0x4   : > { %p31_p1 = scmp.ge.s32.totalorder %s29_s4, 2  ;;  %p225_p2 = scmp.lt.s32.totalorder %s594_s22, 3 }
   0x6   : > { %s709_s4 = smov (%p31_p1, %s29_s4), 0  ;;  %p226_p3 = pnand %p497_p0, %p225_p2 }
   0x7   : > { %p261_p4 = scmp.lt.s32.totalorder (!%p226_p3), %s586_s20, 1 }
   0x8   : > { %229 = sbr.rel (%p226_p3) target bundleno = 311 (0x137), region = 40 }
   0xd   : > { %v541_v1 = vld [vmem:[%s701_s1 + $0x38] sm:$0xff]  ;;  %v540_v2 = vld [vmem:[%s701_s1 + $0x30] sm:$0xff]  ;;  %v539_v3 = vld [vmem:[%s701_s1 + $0x28] sm:$0xff]  ;;  %s711_s20 = smov (!%p261_p4, %s586_s20), 1  ;;  %vm283_vm0 = vcmask 7168   ;;  %v596_v10 = vmov 0.0  }
   0xe   : > { %354 = vmatpush.bf16.msra.mxu0 %v541_v1  ;;  %v538_v4 = vld [vmem:[%s701_s1 + $0x20] sm:$0xff]  ;;  %v537_v5 = vld [vmem:[%s701_s1 + $0x18] sm:$0xff]  ;;  %v536_v6 = vld [vmem:[%s701_s1 + $0x10] sm:$0xff]  ;;  %s498_s12 = sshll.u32 %s711_s20, 2  ;;  %284 = vst.msk [vmem:[#allocation2] sm:$0xff] %vm283_vm0, %v596_v10  ;;  %s499_s25 = sshll.u32 %s711_s20, 3 }
   0xf   : > { %v535_v7 = vld [vmem:[%s701_s1 + $0x8] sm:$0xff]  ;;  %v534_v8 = vld [vmem:[%s701_s1] sm:$0xff]  ;;  %s264_s17 = scalar_lea.vmem %s700_s0, %s498_s12  ;;  %s278_s28 = scalar_lea.vmem %s705_s5, %s499_s25 }
  0x10   : > { %v285_v9 = vld [vmem:[%s264_s17] sm:$0xf]  ;;  %v569_v21 = vld [vmem:[#allocation3] ss:$0 sm:$0xff] }
  0x11   : > { %v567_v11 = vld [vmem:[%s702_s2] ss:$0 sm:$0xff] }
  0x12   : > { %355 = vmatpush.bf16.msra.mxu0 %v540_v2  ;;  %v568_v14 = vld [vmem:[%s703_s3] ss:$0 sm:$0xff] }
  0x15   : > { %v368_v18 = vld [vmem:[#allocation2] sm:$0xff] }
  0x16   : > { %356 = vmatpush.bf16.msra.mxu0 %v539_v3 }
  0x1a   : > { %357 = vmatpush.bf16.msra.mxu0 %v538_v4 }
  0x1e   : > { %358 = vmatpush.bf16.msra.mxu0 %v537_v5 }
  0x22   : > { %359 = vmatpush.bf16.msra.mxu0 %v536_v6 }
  0x26   : > { %360 = vmatpush.bf16.msra.mxu0 %v535_v7 }
  0x2a   : > { %361 = vmatpush.bf16.msra.mxu0 %v534_v8 }
  0x2d   : > { %362 = vmatmul.bf16.vlgmr.msra.gmra.mxu0 %v285_v9 }
  0xaa   : > { %v363_v12 = vpop.f32.mrf.mxu0 }
  0xab   : > { %v364_v13 = vadd.f32 %v567_v11, %v363_v12 }
  0xad   : > { %570 = vtanh.f32 %v364_v13 }
  0xb2   : > { %v365_v15 = vpop.f32.mrf.mxu0 }
  0xb3   : > { %v571_v16 = vpop.eup %570 }
  0xb4   : > { %v373_v17 = vmul.f32 %v571_v16, %v568_v14 }
  0xb6   : > { %374 = vadd.xlane.f32.xlu0 %v373_v17 }
 0x129   : > { %v375_v19 = vpop.xlane.xlu0 %374 }
 0x12a   : > { %v376_v20 = vadd.f32 %v375_v19, %v368_v18 }
 0x12c   : > { %378 = vst.msk [vmem:[#allocation2] sm:$0xff] %vm283_vm0, %v376_v20 }
 0x133   : > { %v382_v22 = vld [vmem:[#allocation2] sm:$0xff] }
 0x134   : > { %v387_v23 = vadd.f32 %v569_v21, %v382_v22 }
 0x136   : > { %388 = vst.msk [vmem:[%s278_s28] sm:$0xff] %vm283_vm0, %v387_v23 }
 0x137 PF: > { %s17_s22 = sadd.s32 1, %s594_s22   ;;  %s706_s20 = smov %s590_s21 }
 0x138   : > { %p14_p5 = scmp.ge.s32.totalorder %s17_s22, 4   ;;  %s707_s21 = smov %s709_s4 }
 0x13a   :  { %16 = sbr.rel (!%p14_p5) target bundleno = 3 (0x3), region = 87 }

// kernel: _lambda_.4
= control target key start
LH: loop header
LB: loop body
LE: loop exit
PB: predicated region body
PF: predicated region fallthrough
CT: control target
= control target key end

     0   :  { %s523_s12 = smov 0   ;;  %s525_s13 = smov 0   ;;  %s583_s0 = inlined_call_operand.vmem [shape: bf16[16,128], index: 0, kind: input, shape index: {}]   ;;  %s584_s1 = inlined_call_operand.vmem [shape: bf16[128,128], index: 1, kind: input, shape index: {}]   ;;  %s585_s2 = inlined_call_operand.vmem [shape: f32[1,128], index: 2, kind: input, shape index: {}]   ;;  %s586_s3 = inlined_call_operand.vmem [shape: bf16[16,128], index: 3, kind: output, shape index: {}]  }
   0x1   :  { %s527_s14 = smov 0  }
   0x2 LB: > { %s25_s15 = sadd.s32 1, %s497_s13  ;;  %p407_p0 = scmp.ge.s32.totalorder %s501_s14, 1  ;;  %s501_s14 = sphi %s527_s14, %s13_s14   ;;  %s497_s13 = sphi %s525_s13, %s588_s13   ;;  %s493_s12 = sphi %s523_s12, %s587_s12  }
   0x3   : > { %p27_p1 = scmp.ge.s32.totalorder %s25_s15, 2  ;;  %p167_p2 = scmp.lt.s32.totalorder %s501_s14, 3 }
   0x5   : > { %s590_s15 = smov (%p27_p1, %s25_s15), 0  ;;  %p168_p3 = pnand %p407_p0, %p167_p2 }
   0x6   : > { %p199_p4 = scmp.lt.s32.totalorder (!%p168_p3), %s493_s12, 1 }
   0x7   : > { %171 = sbr.rel (%p168_p3) target bundleno = 182 (0xb6), region = 32 }
   0xc   : > { %v451_v0 = vld [vmem:[%s584_s1 + $0x38] sm:$0xff]  ;;  %v450_v1 = vld [vmem:[%s584_s1 + $0x30] sm:$0xff]  ;;  %v449_v2 = vld [vmem:[%s584_s1 + $0x28] sm:$0xff]  ;;  %s592_s12 = smov (!%p199_p4, %s493_s12), 1 }
   0xd   : > { %286 = vmatpush.bf16.msra.mxu0 %v451_v0  ;;  %v448_v3 = vld [vmem:[%s584_s1 + $0x20] sm:$0xff]  ;;  %v447_v4 = vld [vmem:[%s584_s1 + $0x18] sm:$0xff]  ;;  %v446_v5 = vld [vmem:[%s584_s1 + $0x10] sm:$0xff]  ;;  %s408_s30 = sshll.u32 %s592_s12, 2 }
   0xe   : > { %v445_v6 = vld [vmem:[%s584_s1 + $0x8] sm:$0xff]  ;;  %v444_v7 = vld [vmem:[%s584_s1] sm:$0xff]  ;;  %s202_s8 = scalar_lea.vmem %s583_s0, %s408_s30  ;;  %s216_s16 = scalar_lea.vmem %s586_s3, %s408_s30 }
   0xf   : > { %v217_v8 = vld [vmem:[%s202_s8] sm:$0xf] }
  0x10   : > { %v476_v9 = vld [vmem:[%s585_s2] ss:$0 sm:$0xff] }
  0x11   : > { %287 = vmatpush.bf16.msra.mxu0 %v450_v1 }
  0x15   : > { %288 = vmatpush.bf16.msra.mxu0 %v449_v2 }
  0x19   : > { %289 = vmatpush.bf16.msra.mxu0 %v448_v3 }
  0x1d   : > { %290 = vmatpush.bf16.msra.mxu0 %v447_v4 }
  0x21   : > { %291 = vmatpush.bf16.msra.mxu0 %v446_v5 }
  0x25   : > { %292 = vmatpush.bf16.msra.mxu0 %v445_v6 }
  0x29   : > { %293 = vmatpush.bf16.msra.mxu0 %v444_v7 }
  0x2c   : > { %294 = vmatmul.bf16.vlgmr.msra.gmra.mxu0 %v217_v8 }
  0xa9   : > { %v295_v10 = vpop.f32.mrf.mxu0 }
  0xaa   : > { %v296_v11 = vadd.f32 %v476_v9, %v295_v10 }
  0xac   : > { %477 = vtanh.f32 %v296_v11 }
  0xb1   : > { %v297_v12 = vpop.f32.mrf.mxu0 }
  0xb2   : > { %v478_v13 = vpop.eup %477 }
  0xb3   : > { %v300_v14 = vpack.c.bf16 %v478_v13, %v478_v13 }
  0xb5   : > { %301 = vst [vmem:[%s216_s16] sm:$0xf] %v300_v14 }
  0xb6 PF: > { %s13_s14 = sadd.s32 1, %s501_s14   ;;  %s587_s12 = smov %s497_s13 }
  0xb7   : > { %p10_p5 = scmp.ge.s32.totalorder %s13_s14, 4   ;;  %s588_s13 = smov %s590_s15 }
  0xb9   :  { %12 = sbr.rel (!%p10_p5) target bundleno = 2 (0x2), region = 68 }

// kernel: _lambda_.5
= control target key start
LH: loop header
LB: loop body
LE: loop exit
PB: predicated region body
PF: predicated region fallthrough
CT: control target
= control target key end

     0   :  { %s519_s12 = smov 0   ;;  %s521_s13 = smov 0   ;;  %s579_s0 = inlined_call_operand.vmem [shape: bf16[16,128], index: 0, kind: input, shape index: {}]   ;;  %s580_s1 = inlined_call_operand.vmem [shape: bf16[128,128], index: 1, kind: input, shape index: {}]   ;;  %s581_s2 = inlined_call_operand.vmem [shape: f32[1,128], index: 2, kind: input, shape index: {}]   ;;  %s582_s3 = inlined_call_operand.vmem [shape: f32[16,128], index: 3, kind: output, shape index: {}]  }
   0x1   :  { %s523_s14 = smov 0  }
   0x2 LB: > { %s25_s15 = sadd.s32 1, %s493_s13  ;;  %p405_p0 = scmp.ge.s32.totalorder %s497_s14, 1  ;;  %s497_s14 = sphi %s523_s14, %s13_s14   ;;  %s493_s13 = sphi %s521_s13, %s584_s13   ;;  %s489_s12 = sphi %s519_s12, %s583_s12  }
   0x3   : > { %p27_p1 = scmp.ge.s32.totalorder %s25_s15, 2  ;;  %p167_p2 = scmp.lt.s32.totalorder %s497_s14, 3 }
   0x5   : > { %s586_s15 = smov (%p27_p1, %s25_s15), 0  ;;  %p168_p3 = pnand %p405_p0, %p167_p2 }
   0x6   : > { %p199_p4 = scmp.lt.s32.totalorder (!%p168_p3), %s489_s12, 1 }
   0x7   : > { %171 = sbr.rel (%p168_p3) target bundleno = 178 (0xb2), region = 32 }
   0xc   : > { %v449_v0 = vld [vmem:[%s580_s1 + $0x38] sm:$0xff]  ;;  %v448_v1 = vld [vmem:[%s580_s1 + $0x30] sm:$0xff]  ;;  %v447_v2 = vld [vmem:[%s580_s1 + $0x28] sm:$0xff]  ;;  %s588_s12 = smov (!%p199_p4, %s489_s12), 1 }
   0xd   : > { %286 = vmatpush.bf16.msra.mxu0 %v449_v0  ;;  %v446_v3 = vld [vmem:[%s580_s1 + $0x20] sm:$0xff]  ;;  %v445_v4 = vld [vmem:[%s580_s1 + $0x18] sm:$0xff]  ;;  %v444_v5 = vld [vmem:[%s580_s1 + $0x10] sm:$0xff]  ;;  %s406_s30 = sshll.u32 %s588_s12, 2  ;;  %s407_s9 = sshll.u32 %s588_s12, 3 }
   0xe   : > { %v443_v6 = vld [vmem:[%s580_s1 + $0x8] sm:$0xff]  ;;  %v442_v7 = vld [vmem:[%s580_s1] sm:$0xff]  ;;  %s202_s8 = scalar_lea.vmem %s579_s0, %s406_s30  ;;  %s216_s18 = scalar_lea.vmem %s582_s3, %s407_s9 }
   0xf   : > { %v217_v8 = vld [vmem:[%s202_s8] sm:$0xf] }
  0x10   : > { %v474_v9 = vld [vmem:[%s581_s2] ss:$0 sm:$0xff] }
  0x11   : > { %287 = vmatpush.bf16.msra.mxu0 %v448_v1 }
  0x15   : > { %288 = vmatpush.bf16.msra.mxu0 %v447_v2 }
  0x19   : > { %289 = vmatpush.bf16.msra.mxu0 %v446_v3 }
  0x1d   : > { %290 = vmatpush.bf16.msra.mxu0 %v445_v4 }
  0x21   : > { %291 = vmatpush.bf16.msra.mxu0 %v444_v5 }
  0x25   : > { %292 = vmatpush.bf16.msra.mxu0 %v443_v6 }
  0x29   : > { %293 = vmatpush.bf16.msra.mxu0 %v442_v7 }
  0x2c   : > { %294 = vmatmul.bf16.vlgmr.msra.gmra.mxu0 %v217_v8 }
  0xa9   : > { %v295_v10 = vpop.f32.mrf.mxu0 }
  0xaa   : > { %v296_v11 = vadd.f32 %v474_v9, %v295_v10 }
  0xac   : > { %299 = vst [vmem:[%s216_s18] sm:$0xff] %v296_v11 }
  0xb1   : > { %v297_v12 = vpop.f32.mrf.mxu0 }
  0xb2 PF: > { %s13_s14 = sadd.s32 1, %s497_s14   ;;  %s583_s12 = smov %s493_s13 }
  0xb3   : > { %p10_p5 = scmp.ge.s32.totalorder %s13_s14, 4   ;;  %s584_s13 = smov %s586_s15 }
  0xb5   :  { %12 = sbr.rel (!%p10_p5) target bundleno = 2 (0x2), region = 68 }

</bundles_post_ra>
